<compile_context>
chip_gen: v7x
topology: tpu7x:2x2x1
jax: 0.10.0
libtpu: 0.0.40
codegen_flags: <defaults>
</compile_context>

<pallas_src>
import functools

import jax
import jax.numpy as jnp
from jax.experimental import pallas as pl
from jax.experimental.pallas import tpu as pltpu


def _se_kernel(x_ref, w1_ref, b1_ref, w2_ref, b2_ref, o_ref, *, inv_hw):
    """One (Nb, C, HWp) block: squeeze -> excite -> scale.

    x_ref : (Nb, C, HWp)   input block (HWp 128-lane padded; pad lanes are 0)
    w1_ref: (Hd, C)  b1_ref: (1, Hd)  w2_ref: (C, Hd)  b2_ref: (1, C)
    """
    x = x_ref[...]                                             # (Nb, C, HWp)

    # --- squeeze: global average pool over spatial lanes.
    #     Padding lanes are zero, so sum * (1 / true_HW) is the exact mean.
    m = jnp.sum(x.astype(jnp.float32), axis=-1) * inv_hw       # (Nb, C)

    # --- excitation: 1x1 convs == tiny channel matmuls.  C and hidden are far
    #     below 128, so keep them on the VPU/XLU (broadcast-mul + lane reduce)
    #     rather than padding out a 128-wide MXU pass.
    y1 = jnp.sum(w1_ref[...][None, :, :] * m[:, None, :], axis=-1) + b1_ref[...]   # (Nb, Hd)
    y1 = jnp.maximum(y1, 0.0)                                                      # ReLU
    y2 = jnp.sum(w2_ref[...][None, :, :] * y1[:, None, :], axis=-1) + b2_ref[...]  # (Nb, C)
    s = jax.nn.sigmoid(y2)                                                         # (Nb, C)

    # --- scale: per-(batch, channel) gate broadcast across the lane dim.
    o_ref[...] = (x * s.astype(x.dtype)[:, :, None]).astype(o_ref.dtype)


def se_layer(x, w1, b1, w2, b2, *, target_block_bytes=4 << 20):
    """SE layer forward.  x: (N, C, H, W); w1: (Hd, C); b1: (Hd,); w2: (C, Hd); b2: (C,)."""
    N, C, H, W = x.shape
    hidden = w1.shape[0]
    HW = H * W
    # Lane-dense load/store path: pad flattened spatial dim to a multiple of 128.
    HWp = ((HW + 127) // 128) * 128

    x_flat = x.reshape(N, C, HW)
    if HWp != HW:
        x_flat = jnp.pad(x_flat, ((0, 0), (0, 0), (0, HWp - HW)))

    # Fuse batch elements per grid step so each streamed block is a few MiB
    # (per-step overhead is ~0.35 us; tiny blocks sit far below HBM roofline).
    per_batch_bytes = C * HWp * jnp.dtype(x.dtype).itemsize
    nb = int(max(1, min(N, target_block_bytes // max(1, per_batch_bytes))))
    while N % nb != 0:          # keep blocks uniform (nb divides N)
        nb -= 1

    b1r = b1.reshape(1, hidden)
    b2r = b2.reshape(1, C)

    kernel = functools.partial(_se_kernel, inv_hw=1.0 / HW)

    out_flat = pl.pallas_call(
        kernel,
        out_shape=jax.ShapeDtypeStruct((N, C, HWp), x.dtype),
        grid=(N // nb,),
        in_specs=[
            pl.BlockSpec((nb, C, HWp), lambda b: (b, 0, 0)),   # x block (batch-fused)
            pl.BlockSpec((hidden, C), lambda b: (0, 0)),       # w1 (full, resident)
            pl.BlockSpec((1, hidden), lambda b: (0, 0)),       # b1
            pl.BlockSpec((C, hidden), lambda b: (0, 0)),       # w2
            pl.BlockSpec((1, C), lambda b: (0, 0)),            # b2
        ],
        out_specs=pl.BlockSpec((nb, C, HWp), lambda b: (b, 0, 0)),
        compiler_params=pltpu.CompilerParams(
            dimension_semantics=("parallel",),
            # Explicit VMEM budget: ~4 MiB x block, double-buffered in+out plus
            # f32 temporaries stays well under v7x's 64 MiB physical VMEM and
            # above the 16/32 MiB scoped defaults on v5e/v6e.
            vmem_limit_bytes=48 << 20,
        ),
    )(x_flat, w1, b1r, w2, b2r)

    if HWp != HW:
        out_flat = out_flat[:, :, :HW]
    return out_flat.reshape(N, C, H, W)


def se_layer_ref(x, w1, b1, w2, b2):
    """Pure-JAX reference matching the PyTorch forward."""
    m = jnp.mean(x, axis=(2, 3))                               # (N, C)
    y = jnp.einsum("hc,nc->nh", w1, m) + b1                    # (N, Hd)
    y = jnp.maximum(y, 0.0)
    y = jnp.einsum("ch,nh->nc", w2, y) + b2                    # (N, C)
    s = jax.nn.sigmoid(y)[:, :, None, None]                    # (N, C, 1, 1)
    return x * s


def _make_inputs(key, N, dim, H, W, reduction):
    hidden = dim // reduction
    kx, kw1, kb1, kw2, kb2 = jax.random.split(key, 5)
    x = jax.random.normal(kx, (N, dim, H, W), dtype=jnp.float32)
    # Deterministic init mimicking Conv2d(kernel=1) fan-in scaling.
    w1 = jax.random.normal(kw1, (hidden, dim), dtype=jnp.float32) / jnp.sqrt(dim)
    b1 = jax.random.normal(kb1, (hidden,), dtype=jnp.float32) * 0.1
    w2 = jax.random.normal(kw2, (dim, hidden), dtype=jnp.float32) / jnp.sqrt(hidden)
    b2 = jax.random.normal(kb2, (dim,), dtype=jnp.float32) * 0.1
    return x, w1, b1, w2, b2


if __name__ == "__main__":
    key = jax.random.PRNGKey(0)
    k0, k1 = jax.random.split(key, 2)

    # Case 1: module config dim=8, reduction=4 -> hidden=2; HW=256 (128-aligned).
    x, w1, b1, w2, b2 = _make_inputs(k0, N=2, dim=8, H=16, W=16, reduction=4)
    out = jax.block_until_ready(se_layer(x, w1, b1, w2, b2))
    ref = se_layer_ref(x, w1, b1, w2, b2)
    assert out.shape == x.shape
    assert jnp.allclose(out, ref, atol=1e-5, rtol=1e-5), "mismatch vs reference (case 1)"

    # Case 2: non-128-aligned spatial (14x14=196 -> padded to 256); exercises
    # the lane-padding path and the exact-mean-over-true-HW correction.
    x2, w12, b12, w22, b22 = _make_inputs(k1, N=3, dim=16, H=14, W=14, reduction=4)
    out2 = jax.block_until_ready(se_layer(x2, w12, b12, w22, b22))
    ref2 = se_layer_ref(x2, w12, b12, w22, b22)
    assert out2.shape == x2.shape
    assert jnp.allclose(out2, ref2, atol=1e-5, rtol=1e-5), "mismatch vs reference (case 2)"

    print("KERNEL_OK")
</pallas_src>

<mosaic_0001>
module attributes {stable_mosaic.version = 11 : i64} {
  func.func @_se_kernel(%arg0: i32, %arg1: memref<2x8x256xf32, #tpu.memory_space<vmem>>, %arg2: memref<2x8xf32, #tpu.memory_space<vmem>>, %arg3: memref<1x2xf32, #tpu.memory_space<vmem>>, %arg4: memref<8x2xf32, #tpu.memory_space<vmem>>, %arg5: memref<1x8xf32, #tpu.memory_space<vmem>>, %arg6: memref<2x8x256xf32, #tpu.memory_space<vmem>>) attributes {dimension_semantics = [#tpu.dimension_semantics<parallel>], iteration_bounds = array<i64: 1>, scalar_prefetch = 0 : i64, scratch_operands = 0 : i64, tpu.core_type = #tpu.core_type<tc>, window_params = [{transform_indices = @transform_0, window_bounds = array<i64: 2, 8, 256>}, {pipeline_mode = #tpu.pipeline_mode<synchronous>, transform_indices = @transform_1, window_bounds = array<i64: 2, 8>}, {pipeline_mode = #tpu.pipeline_mode<synchronous>, transform_indices = @transform_2, window_bounds = array<i64: 1, 2>}, {pipeline_mode = #tpu.pipeline_mode<synchronous>, transform_indices = @transform_3, window_bounds = array<i64: 8, 2>}, {pipeline_mode = #tpu.pipeline_mode<synchronous>, transform_indices = @transform_4, window_bounds = array<i64: 1, 8>}, {transform_indices = @transform_5, window_bounds = array<i64: 2, 8, 256>}]} {
    %c0 = arith.constant 0 : index
    %c0_0 = arith.constant 0 : index
    %c0_1 = arith.constant 0 : index
    %0 = vector.load %arg1[%c0, %c0_0, %c0_1] : memref<2x8x256xf32, #tpu.memory_space<vmem>>, vector<2x8x256xf32>
    %cst = arith.constant dense<0.000000e+00> : vector<2x8xf32>
    %1 = vector.multi_reduction <add>, %0, %cst [2] : vector<2x8x256xf32> to vector<2x8xf32>
    %cst_2 = arith.constant 3.906250e-03 : f32
    %2 = vector.broadcast %cst_2 : f32 to vector<2x8xf32>
    %3 = arith.mulf %1, %2 : vector<2x8xf32>
    %c0_3 = arith.constant 0 : index
    %c0_4 = arith.constant 0 : index
    %4 = vector.load %arg2[%c0_3, %c0_4] : memref<2x8xf32, #tpu.memory_space<vmem>>, vector<2x8xf32>
    %5 = vector.shape_cast %4 : vector<2x8xf32> to vector<1x2x8xf32>
    %6 = vector.shape_cast %3 : vector<2x8xf32> to vector<2x1x8xf32>
    %7 = vector.broadcast %5 : vector<1x2x8xf32> to vector<2x2x8xf32>
    %8 = vector.broadcast %6 : vector<2x1x8xf32> to vector<2x2x8xf32>
    %9 = arith.mulf %7, %8 : vector<2x2x8xf32>
    %cst_5 = arith.constant dense<0.000000e+00> : vector<2x2xf32>
    %10 = vector.multi_reduction <add>, %9, %cst_5 [2] : vector<2x2x8xf32> to vector<2x2xf32>
    %c0_6 = arith.constant 0 : index
    %c0_7 = arith.constant 0 : index
    %11 = vector.load %arg3[%c0_6, %c0_7] : memref<1x2xf32, #tpu.memory_space<vmem>>, vector<1x2xf32>
    %12 = vector.broadcast %11 : vector<1x2xf32> to vector<2x2xf32>
    %13 = arith.addf %10, %12 : vector<2x2xf32>
    %cst_8 = arith.constant 0.000000e+00 : f32
    %14 = vector.broadcast %cst_8 : f32 to vector<2x2xf32>
    %15 = arith.maximumf %13, %14 : vector<2x2xf32>
    %c0_9 = arith.constant 0 : index
    %c0_10 = arith.constant 0 : index
    %16 = vector.load %arg4[%c0_9, %c0_10] : memref<8x2xf32, #tpu.memory_space<vmem>>, vector<8x2xf32>
    %17 = vector.shape_cast %16 : vector<8x2xf32> to vector<1x8x2xf32>
    %18 = vector.shape_cast %15 : vector<2x2xf32> to vector<2x1x2xf32>
    %19 = vector.broadcast %17 : vector<1x8x2xf32> to vector<2x8x2xf32>
    %20 = vector.broadcast %18 : vector<2x1x2xf32> to vector<2x8x2xf32>
    %21 = arith.mulf %19, %20 : vector<2x8x2xf32>
    %cst_11 = arith.constant dense<0.000000e+00> : vector<2x8xf32>
    %22 = vector.multi_reduction <add>, %21, %cst_11 [2] : vector<2x8x2xf32> to vector<2x8xf32>
    %c0_12 = arith.constant 0 : index
    %c0_13 = arith.constant 0 : index
    %23 = vector.load %arg5[%c0_12, %c0_13] : memref<1x8xf32, #tpu.memory_space<vmem>>, vector<1x8xf32>
    %24 = vector.broadcast %23 : vector<1x8xf32> to vector<2x8xf32>
    %25 = arith.addf %22, %24 : vector<2x8xf32>
    %26 = arith.negf %25 : vector<2x8xf32>
    %27 = math.exp %26 : vector<2x8xf32>
    %cst_14 = arith.constant 1.000000e+00 : f32
    %28 = vector.broadcast %cst_14 : f32 to vector<2x8xf32>
    %29 = arith.addf %28, %27 : vector<2x8xf32>
    %30 = arith.divf %28, %29 : vector<2x8xf32>
    %31 = vector.shape_cast %30 : vector<2x8xf32> to vector<2x8x1xf32>
    %32 = vector.broadcast %31 : vector<2x8x1xf32> to vector<2x8x256xf32>
    %33 = arith.mulf %0, %32 : vector<2x8x256xf32>
    %c0_15 = arith.constant 0 : index
    %c0_16 = arith.constant 0 : index
    %c0_17 = arith.constant 0 : index
    %34 = vector.load %arg6[%c0_15, %c0_16, %c0_17] : memref<2x8x256xf32, #tpu.memory_space<vmem>>, vector<2x8x256xf32>
    tpu.vector_store %arg6[%c0_15, %c0_16, %c0_17], %33 {strides = array<i32>} : memref<2x8x256xf32, #tpu.memory_space<vmem>>, vector<2x8x256xf32>,
    return
  }
  func.func @transform_0(%arg0: i32) -> (i32, i32, i32) {
    %c0_i32 = arith.constant 0 : i32
    %c0_i32_0 = arith.constant 0 : i32
    %c0_i32_1 = arith.constant 0 : i32
    return %arg0, %c0_i32, %c0_i32_0 : i32, i32, i32
  }
  func.func @transform_1(%arg0: i32) -> (i32, i32) {
    %c0_i32 = arith.constant 0 : i32
    %c0_i32_0 = arith.constant 0 : i32
    %c0_i32_1 = arith.constant 0 : i32
    return %c0_i32, %c0_i32_0 : i32, i32
  }
  func.func @transform_2(%arg0: i32) -> (i32, i32) {
    %c0_i32 = arith.constant 0 : i32
    %c0_i32_0 = arith.constant 0 : i32
    %c0_i32_1 = arith.constant 0 : i32
    return %c0_i32, %c0_i32_0 : i32, i32
  }
  func.func @transform_3(%arg0: i32) -> (i32, i32) {
    %c0_i32 = arith.constant 0 : i32
    %c0_i32_0 = arith.constant 0 : i32
    %c0_i32_1 = arith.constant 0 : i32
    return %c0_i32, %c0_i32_0 : i32, i32
  }
  func.func @transform_4(%arg0: i32) -> (i32, i32) {
    %c0_i32 = arith.constant 0 : i32
    %c0_i32_0 = arith.constant 0 : i32
    %c0_i32_1 = arith.constant 0 : i32
    return %c0_i32, %c0_i32_0 : i32, i32
  }
  func.func @transform_5(%arg0: i32) -> (i32, i32, i32) {
    %c0_i32 = arith.constant 0 : i32
    %c0_i32_0 = arith.constant 0 : i32
    %c0_i32_1 = arith.constant 0 : i32
    return %arg0, %c0_i32, %c0_i32_0 : i32, i32, i32
  }
}

</mosaic_0001>

<bundles_post_ra>
// kernel: tpu_custom_call.1
= control target key start
LH: loop header
LB: loop body
LE: loop exit
PB: predicated region body
PF: predicated region fallthrough
CT: control target
= control target key end

     0   :  { %10 = vsyncpa [#allocation3], 0  ;;  %s350_s0 = inlined_call_operand.hbm [shape: f32[2,8,256], index: 0, kind: input, shape index: {}]   ;;  %s351_s1 = inlined_call_operand.vmem [shape: f32[2,8], index: 1, kind: input, shape index: {}]   ;;  %s352_s2 = inlined_call_operand.vmem [shape: f32[1,2], index: 2, kind: input, shape index: {}]   ;;  %s353_s3 = inlined_call_operand.vmem [shape: f32[8,2], index: 3, kind: input, shape index: {}]   ;;  %s354_s4 = inlined_call_operand.vmem [shape: f32[1,8], index: 4, kind: input, shape index: {}]   ;;  %s355_s5 = inlined_call_operand.hbm [shape: f32[2,8,256], index: 5, kind: output, shape index: {}]  }
   0x1   :  { %11 = vsyncpa [#allocation4], 0  ;;  %s257_s18 = smov [#allocation2]   ;;  %s209_s22 = scalar_lea.hbm %s350_s0, 512 }
   0x2   :  { %s17_s19 = sshll.u32 %s257_s18, 4  ;;  %p210_p0 = scmp.ne.s32.totalorder %s350_s0, %s209_s22  ;;  %s18_s19 = int_to_ptr.vmem [resolvable:$true] %s17_s19 }
   0x3   :  { %p213_p1 = scmp.lt.u32.totalorder %s209_s22, %s350_s0 }
   0x5   :  { %p215_p2 = pnand %p213_p1, %p210_p0 }
   0x7   :  { %218 = shalt.err (!%p215_p2)
}
   0x8   :  { %s219_s27 = scalar_lea.vmem %s18_s19, 512  ;;  %p224_p4 = scmp.lt.s32.totalorder %s18_s19, %s18_s19 }
   0x9   :  { %p220_p3 = scmp.ne.s32.totalorder %s18_s19, %s219_s27  ;;  %p225_p5 = scmp.lt.s32.totalorder %s219_s27, %s219_s27 }
   0xb   :  { %p226_p6 = por %p225_p5, %p224_p4 }
   0xd   :  { %p227_p7 = pnand %p226_p6, %p220_p3 }
   0xf   :  { %230 = shalt.err (!%p227_p7)
}
  0x10   :  { %s258_s28 = smov 256   ;;  %s259_s29 = smov 16  }
  0x11   :  { %23 = dma.hbm_to_vmem [thread:$0]  %s350_s0, 512, %s18_s19, [#allocation3], %s258_s28, %s258_s28, %s259_s29  }
  0x12   :  { %253 = dma.done.wait [#allocation3], 512  }
  0x13   :  { %254 = vsyncadd [#allocation3], 4294966784  ;;  %v307_v0 = vld [vmem:[#allocation2] sm:$0xff]  ;;  %v309_v1 = vld [vmem:[#allocation2 + $0x8] sm:$0xff]  ;;  %v50_v7 = vlaneseq  ;;  %vm64_vm0 = vcmask 58368   ;;  %v260_v22 = vmov 0  }
  0x14   :  { %v311_v2 = vld [vmem:[#allocation2 + $0x10] sm:$0xff]  ;;  %v39_v3 = vadd.f32 %v309_v1, %v307_v0  ;;  %v315_v4 = vld [vmem:[#allocation2 + $0x18] sm:$0xff]  ;;  %v190_v6 = vld [vmem:[%s352_s2] ss:$0 sm:$0xff]  ;;  %199 = vset.pattern.permute.xlu1 %v260_v22  ;;  %200 = vset.pattern.permute.xlu0 %v260_v22  ;;  %vm124_vm1 = vcmask 15360  }
  0x15   :  { %v42_v5 = vadd.f32 %v315_v4, %v311_v2  ;;  %v51_v8 = vand.u32 127, %v50_v7  ;;  %v53_v9 = vshrl.u32 %v50_v7, 7  ;;  %v47_v13 = vld [vmem:[%s351_s1] sm:$0x3] }
  0x16   :  { %40 = vadd.xlane.f32.xlu0 %v39_v3  ;;  %v85_v31 = vld [vmem:[%s353_s3] sm:$0xff]  ;;  %s261_s3 = smov [#allocation5]  }
  0x17   :  { %v54_v10 = vsub.s32 %v51_v8, %v53_v9  ;;  %v191_v39 = vld [vmem:[%s354_s4] ss:$0 sm:$0xff]  ;;  %s178_s4 = sshll.u32 %s261_s3, 4  ;;  %s179_s4 = int_to_ptr.vmem [resolvable:$true] %s178_s4 }
  0x18   :  { %s231_s12 = scalar_lea.vmem %s179_s4, 512  ;;  %p236_p9 = scmp.lt.s32.totalorder %s179_s4, %s179_s4 }
  0x19   :  { %p232_p8 = scmp.ne.s32.totalorder %s179_s4, %s231_s12  ;;  %p237_p10 = scmp.lt.s32.totalorder %s231_s12, %s231_s12 }
  0x1a   :  { %43 = vadd.xlane.f32.xlu0 %v42_v5 }
  0x1b   :  { %p238_p11 = por %p237_p10, %p236_p9 }
  0x1d   :  { %p239_p12 = pnand %p238_p11, %p232_p8 }
  0x30   :  { %78 = vbcast.lane.b32.xlu0 %v190_v6, 256 }
  0xa3   :  { %v41_v11 = vpop.xlane.xlu0 %40 }
  0xa4   :  { %v45_v12 = vmul.f32 0.00390625, %v41_v11 }
  0xa6   :  { %v55_v14 = vrot.slane %v45_v12, %v54_v10 }
  0xa7   :  { %v44_v15 = vpop.xlane.xlu0 %43 }
  0xa8   :  { %v46_v16 = vmul.f32 0.00390625, %v44_v15  ;;  %v62_v17 = vmul.f32 %v55_v14, %v47_v13 }
  0xaa   :  { %v59_v18 = vrot.slane %v46_v16, %v54_v10  ;;  %v65_v19 = vsel %vm64_vm0, %v62_v17, 0.0 }
  0xab   :  { %66 = vadd.xlane.f32.xlu1 %v65_v19  ;;  %v79_v23 = vpop.permute.xlu0 %78 }
  0xac   :  { %v63_v20 = vmul.f32 %v59_v18, %v47_v13 }
  0xae   :  { %v68_v21 = vsel %vm64_vm0, %v63_v20, 0.0 }
  0xaf   :  { %69 = vadd.xlane.f32.xlu1 %v68_v21 }
 0x138   :  { %v67_v24 = vpop.xlane.xlu1 %66 }
 0x139   :  { %v81_v25 = vadd.f32 %v79_v23, %v67_v24 }
 0x13b   :  { %v83_v26 = vmax.f32 %v81_v25, 0.0 }
 0x13c   :  { %v70_v27 = vpop.xlane.xlu1 %69 }
 0x13d   :  { %v82_v28 = vadd.f32 %v79_v23, %v70_v27  ;;  %89 = vperm.xlu1 %199, %v83_v26  }
 0x13f   :  { %v84_v29 = vmax.f32 %v82_v28, 0.0 }
 0x141   :  { %92 = vperm.xlu1 %199, %v84_v29  }
 0x1bc   :  { %v90_v30 = vpop.permute.xlu1 %89 }
 0x1bd   :  { %v97_v32 = vrot.slane %v90_v30, %v54_v10 }
 0x1bf   :  { %v122_v33 = vmul.f32 %v97_v32, %v85_v31 }
 0x1c0   :  { %v93_v34 = vpop.permute.xlu1 %92 }
 0x1c1   :  { %v101_v35 = vrot.slane %v93_v34, %v54_v10  ;;  %v125_v36 = vsel %vm124_vm1, %v122_v33, 0.0 }
 0x1c2   :  { %126 = vadd.xlane.f32.xlu1 %v125_v36 }
 0x1c3   :  { %v123_v37 = vmul.f32 %v101_v35, %v85_v31 }
 0x1c5   :  { %v128_v38 = vsel %vm124_vm1, %v123_v37, 0.0 }
 0x1c6   :  { %129 = vadd.xlane.f32.xlu0 %v128_v38 }
 0x1dc   :  { %138 = vbcast.lane.b32.xlu0 %v191_v39, 256 }
 0x24f   :  { %v127_v41 = vpop.xlane.xlu1 %126 }
 0x253   :  { %v130_v40 = vpop.xlane.xlu0 %129 }
 0x257   :  { %v139_v42 = vpop.permute.xlu0 %138 }
 0x258   :  { %v141_v43 = vadd.f32 %v139_v42, %v127_v41  ;;  %v142_v44 = vadd.f32 %v139_v42, %v130_v40 }
 0x25a   :  { %v192_v45 = vmul.f32 -1.442695, %v141_v43  ;;  %v193_v46 = vmul.f32 -1.442695, %v142_v44 }
 0x25c   :  { %201 = vpow2.f32 %v192_v45 }
 0x25d   :  { %203 = vpow2.f32 %v193_v46 }
 0x266   :  { %v202_v47 = vpop.eup %201 }
 0x267   :  { %v204_v48 = vpop.eup %203  ;;  %v149_v49 = vadd.f32 1.0, %v202_v47 }
 0x268   :  { %v150_v50 = vadd.f32 1.0, %v204_v48 }
 0x269   :  { %205 = vrcp.f32 %v149_v49 }
 0x26a   :  { %207 = vrcp.f32 %v150_v50 }
 0x273   :  { %v206_v51 = vpop.eup %205 }
 0x274   :  { %157 = vperm.xlu1 %199, %v206_v51   ;;  %v208_v52 = vpop.eup %207 }
 0x278   :  { %162 = vperm.xlu1 %199, %v208_v52  }
 0x2f3   :  { %v158_v53 = vpop.permute.xlu1 %157 }
 0x2f4   :  { %v165_v54 = vmul.f32 %v158_v53, %v307_v0  ;;  %v166_v55 = vmul.f32 %v158_v53, %v309_v1 }
 0x2f6   :  { %169 = vst [vmem:[#allocation5] sm:$0xff] %v165_v54  ;;  %170 = vst [vmem:[#allocation5 + $0x8] sm:$0xff] %v166_v55 }
 0x2f7   :  { %v163_v56 = vpop.permute.xlu1 %162 }
 0x2f8   :  { %v167_v57 = vmul.f32 %v163_v56, %v311_v2  ;;  %v168_v58 = vmul.f32 %v163_v56, %v315_v4 }
 0x2fa   :  { %171 = vst [vmem:[#allocation5 + $0x10] sm:$0xff] %v167_v57  ;;  %172 = vst [vmem:[#allocation5 + $0x18] sm:$0xff] %v168_v58 }
 0x2fb   :  { %242 = shalt.err (!%p239_p12)
}
 0x2fc   :  { %s243_s15 = scalar_lea.hbm %s355_s5, 512 }
 0x2fd   :  { %p244_p13 = scmp.ne.s32.totalorder %s355_s5, %s243_s15  ;;  %p247_p0 = scmp.lt.u32.totalorder %s243_s15, %s355_s5 }
 0x2ff   :  { %p249_p1 = pnand %p247_p0, %p244_p13 }
 0x301   :  { %252 = shalt.err (!%p249_p1)
}
 0x302   :  { %184 = dma.vmem_to_hbm [thread:$0]  %s179_s4, 512, %s355_s5, [#allocation4], %s258_s28, %s258_s28, %s259_s29  }
 0x303   :  { %255 = dma.done.wait [#allocation4], 512  }
 0x304   :  { %256 = vsyncadd [#allocation4], 4294966784 }
 0x305   :  { %188 = vsyncpa [#allocation3], 1 }
 0x306   :  { %189 = vsyncpa [#allocation4], 1 }

</bundles_post_ra>
